<compile_context>
chip_gen: v7x
topology: tpu7x:2x2x1
jax: 0.10.0
libtpu: 0.0.40
codegen_flags: <defaults>
</compile_context>

<pallas_src>
import functools

import jax
import jax.numpy as jnp
from jax import lax
from jax.experimental import pallas as pl
from jax.experimental.pallas import tpu as pltpu


def _round_up(x, m):
    return (x + m - 1) // m * m


def _rae_ext_kernel(sim_ref, idx_ref, table_ref, *rest, temperature, dist_metric,
                    k_dim, apply_w_in_kernel):
    """One (batch tile, column tile): tempered softmax -> VPU one-hot qkt ->
    bf16 MXU matmul(s) with f32 accumulation."""
    if apply_w_in_kernel:
        w_ref, out_ref = rest
    else:
        (out_ref,) = rest

    block_b, top_k = sim_ref.shape

    # ---- tempered softmax over the top_k axis (VPU + EUP) -------------------
    sim = sim_ref[...].astype(jnp.float32)
    if dist_metric:
        # NOTE: assumes non-negative (L2) distances as FAISS returns them;
        # negative values would NaN exactly like the PyTorch module.
        logits = -jnp.sqrt(sim) * (1.0 / temperature)
    else:
        logits = sim * (1.0 / temperature)
    logits = logits - jnp.max(logits, axis=-1, keepdims=True)
    e = jnp.exp(logits)
    p = e * pl.reciprocal(jnp.sum(e, axis=-1, keepdims=True), approx=False)

    # ---- dense qkt via VPU one-hot (replaces the per-row gather loop) --------
    #   qkt[b, j] = sum_k p[b, k] * (j == indices[b, k])
    # FAISS top-k indices are distinct; -1 padding wraps to the last row
    # (PyTorch fancy-indexing behaviour); any remaining out-of-range value
    # simply matches no column — there is no unchecked memory access.
    idx = idx_ref[...]
    idx = jnp.where(idx < 0, idx + k_dim, idx)
    col = lax.broadcasted_iota(jnp.int32, (block_b, k_dim), 1)
    qkt = jnp.zeros((block_b, k_dim), jnp.float32)
    for k in range(top_k):                      # static, tiny (top_k)
        qkt = qkt + jnp.where(col == idx[:, k:k + 1], p[:, k:k + 1], 0.0)

    # ---- MXU matmul(s): bf16 inputs, f32 accumulation ------------------------
    acc = jnp.dot(qkt.astype(table_ref.dtype), table_ref[...],
                  preferred_element_type=jnp.float32)
    if apply_w_in_kernel:
        acc = jnp.dot(acc.astype(w_ref.dtype), w_ref[...],
                      preferred_element_type=jnp.float32)
    out_ref[...] = acc.astype(out_ref.dtype)


def rae_ext_forward(sim, indices, values_matrix, trainable_matrix, temperature,
                    dist_metric=False, block_b=None, block_v=None,
                    precompute_wv=None):
    """Pallas-backed equivalent of RaeExt.forward, given (sim, indices)."""
    B, K = sim.shape
    k_dim, V = values_matrix.shape
    assert indices.shape == (B, K)
    assert trainable_matrix.shape == (V, V)

    # ---- batch tile ----------------------------------------------------------
    if block_b is None:
        block_b = B if B <= 8 else min(128, _round_up(B, 8))

    # ---- algorithm choice (review: shape-dependent) --------------------------
    # One-hot path MXU work = B*k_dim*V either way; the tail is k_dim*V*V once
    # (wrapper-side WV precompute, identical to the PyTorch module) vs B*V*V
    # per forward (in-kernel second matmul).  Pick the smaller.
    pad_b = pl.cdiv(B, block_b) * block_b
    if precompute_wv is None:
        precompute_wv = k_dim <= pad_b

    # ---- output-column tile --------------------------------------------------
    if block_v is None:
        block_v = V if (not precompute_wv or V <= 1024) else 1024
    if not precompute_wv:
        block_v = V  # two-matmul path keeps the full width (no redundant work)

    n_b = pl.cdiv(B, block_b)
    n_v = pl.cdiv(V, block_v)
    # Megacore (v7x: 2 TCs): make sure the parallel grid has >= 2 steps when
    # the batch tile can be split while staying sublane-aligned.
    while n_b * n_v < 2 and block_b >= 16 and block_b % 16 == 0:
        block_b //= 2
        n_b = pl.cdiv(B, block_b)
    grid = (n_b, n_v)

    # ---- specs (no wrapper-side padding; ragged tiles are masked by Pallas) --
    sim_spec = pl.BlockSpec((block_b, K), lambda i, j: (i, 0))
    idx_spec = pl.BlockSpec((block_b, K), lambda i, j: (i, 0))
    out_spec = pl.BlockSpec((block_b, block_v), lambda i, j: (i, j))

    if precompute_wv:
        # weighted_values = values @ trainable, computed once (batch-independent),
        # exactly as the PyTorch module does; fed to the kernel as bf16.
        wv = jnp.dot(values_matrix.astype(jnp.float32),
                     trainable_matrix.astype(jnp.float32),
                     preferred_element_type=jnp.float32).astype(jnp.bfloat16)
        table_inputs = (wv,)
        table_specs = [pl.BlockSpec((k_dim, block_v), lambda i, j: (0, j))]
        table_resident_bytes = k_dim * block_v * 2
    else:
        table_inputs = (values_matrix.astype(jnp.bfloat16),
                        trainable_matrix.astype(jnp.bfloat16))
        table_specs = [pl.BlockSpec((k_dim, V), lambda i, j: (0, 0)),
                       pl.BlockSpec((V, block_v), lambda i, j: (0, j))]
        table_resident_bytes = k_dim * V * 2 + V * block_v * 2

    kernel = functools.partial(
        _rae_ext_kernel,
        temperature=float(temperature),
        dist_metric=bool(dist_metric),
        k_dim=int(k_dim),
        apply_w_in_kernel=not precompute_wv,
    )

    # ---- compiler params / cost estimate -------------------------------------
    cp_kwargs = dict(dimension_semantics=("parallel", "parallel"))
    vmem_need = 2 * (2 * block_b * K * 4 + block_b * block_v * 4
                     + table_resident_bytes) + (4 << 20)
    if vmem_need > (16 << 20):
        cp_kwargs["vmem_limit_bytes"] = int(min(vmem_need, 128 << 20))

    flops = 2 * B * k_dim * V + B * K * k_dim
    if not precompute_wv:
        flops += 2 * B * V * V
    bytes_accessed = (sim.size * 4 + indices.size * 4 + B * V * 4
                      + sum(int(t.size) * 2 for t in table_inputs))
    cost = pl.CostEstimate(flops=int(flops),
                           transcendentals=int(B * K),
                           bytes_accessed=int(bytes_accessed))

    out = pl.pallas_call(
        kernel,
        out_shape=jax.ShapeDtypeStruct((B, V), jnp.float32),
        grid_spec=pltpu.PrefetchScalarGridSpec(
            num_scalar_prefetch=0,
            grid=grid,
            in_specs=[sim_spec, idx_spec] + table_specs,
            out_specs=out_spec,
        ),
        compiler_params=pltpu.CompilerParams(**cp_kwargs),
        cost_estimate=cost,
    )(sim.astype(jnp.float32), indices.astype(jnp.int32), *table_inputs)
    return out


def _ref_forward(sim, indices, values_matrix, trainable_matrix, temperature,
                 dist_metric=False):
    """Pure-JAX f32 reference mirroring the PyTorch forward, for verification."""
    if dist_metric:
        p = jax.nn.softmax(-jnp.sqrt(sim) / temperature, axis=-1)
    else:
        p = jax.nn.softmax(sim / temperature, axis=-1)
    B = sim.shape[0]
    k_dim = values_matrix.shape[0]
    qkt = jnp.zeros((B, k_dim), jnp.float32)
    qkt = qkt.at[jnp.arange(B)[:, None], indices].set(p)
    wv = values_matrix @ trainable_matrix
    return qkt @ wv


if __name__ == "__main__":
    # Small, module-consistent shapes.
    B, D, K_DIM, TOP_K, V = 8, 32, 128, 8, 128
    TEMPERATURE = 0.5

    key = jax.random.PRNGKey(0)
    k_q, k_keys, k_vals, k_w = jax.random.split(key, 4)

    query_vectors = jax.random.normal(k_q, (B, D), dtype=jnp.float32)
    key_store = jax.random.normal(k_keys, (K_DIM, D), dtype=jnp.float32)
    # values_matrix: (k_dim, num_labels).  trainable_matrix is initialized to
    # eye in the module; perturb slightly (as if partially trained) so the
    # second matmul is non-trivial for verification.
    values_matrix = jax.random.uniform(k_vals, (K_DIM, V), dtype=jnp.float32)
    trainable_matrix = (jnp.eye(V, dtype=jnp.float32)
                        + 0.01 * jax.random.normal(k_w, (V, V), jnp.float32))

    # TODO(synk): FAISS index.search simulated with plain JAX + lax.top_k.
    full_sims = query_vectors @ key_store.T                       # (B, k_dim)
    sim_ip, idx_ip = lax.top_k(full_sims, TOP_K)                  # (B, top_k)

    ref_ip = _ref_forward(sim_ip, idx_ip, values_matrix, trainable_matrix,
                          TEMPERATURE, False)

    # Default (k_dim > batch -> trainable_matrix applied in-kernel, 2 matmuls).
    out_two = jax.block_until_ready(
        rae_ext_forward(sim_ip, idx_ip, values_matrix, trainable_matrix,
                        TEMPERATURE, False))
    assert out_two.shape == (B, V)
    assert jnp.allclose(out_two, ref_ip, atol=2e-2, rtol=2e-2), \
        "mismatch vs reference (in-kernel W path)"

    # Forced WV-precompute path (single in-kernel matmul against values@W).
    out_wv = jax.block_until_ready(
        rae_ext_forward(sim_ip, idx_ip, values_matrix, trainable_matrix,
                        TEMPERATURE, False, precompute_wv=True))
    assert jnp.allclose(out_wv, ref_ip, atol=2e-2, rtol=2e-2), \
        "mismatch vs reference (precomputed WV path)"

    # dist_metric=True: FAISS L2 index returns non-negative squared distances.
    d2 = jnp.sum((query_vectors[:, None, :] - key_store[None, :, :]) ** 2, -1)
    neg_top, idx_l2 = lax.top_k(-d2, TOP_K)
    sim_l2 = jnp.maximum(-neg_top, 0.0)
    assert bool(jnp.all(sim_l2 >= 0.0)), "dist_metric requires non-negative sims"
    ref_l2 = _ref_forward(sim_l2, idx_l2, values_matrix, trainable_matrix,
                          TEMPERATURE, True)
    out_l2 = jax.block_until_ready(
        rae_ext_forward(sim_l2, idx_l2, values_matrix, trainable_matrix,
                        TEMPERATURE, True))
    assert jnp.allclose(out_l2, ref_l2, atol=2e-2, rtol=2e-2), \
        "mismatch vs reference (dist_metric path)"

    print("KERNEL_OK")
</pallas_src>

<mosaic_0001>
module attributes {stable_mosaic.version = 11 : i64} {
  func.func @_rae_ext_kernel(%arg0: i32, %arg1: i32, %arg2: memref<8x8xf32, #tpu.memory_space<vmem>>, %arg3: memref<8x8xi32, #tpu.memory_space<vmem>>, %arg4: memref<128x128xbf16, #tpu.memory_space<vmem>>, %arg5: memref<128x128xbf16, #tpu.memory_space<vmem>>, %arg6: memref<8x128xf32, #tpu.memory_space<vmem>>) attributes {dimension_semantics = [#tpu.dimension_semantics<parallel>, #tpu.dimension_semantics<parallel>], iteration_bounds = array<i64: 1, 1>, scalar_prefetch = 0 : i64, scratch_operands = 0 : i64, tpu.core_type = #tpu.core_type<tc>, window_params = [{transform_indices = @transform_0, window_bounds = array<i64: 8, 8>}, {transform_indices = @transform_1, window_bounds = array<i64: 8, 8>}, {pipeline_mode = #tpu.pipeline_mode<synchronous>, transform_indices = @transform_2, window_bounds = array<i64: 128, 128>}, {transform_indices = @transform_3, window_bounds = array<i64: 128, 128>}, {transform_indices = @transform_4, window_bounds = array<i64: 8, 128>}]} {
    %c0 = arith.constant 0 : index
    %c0_0 = arith.constant 0 : index
    %0 = vector.load %arg2[%c0, %c0_0] : memref<8x8xf32, #tpu.memory_space<vmem>>, vector<8x8xf32>
    %cst = arith.constant 2.000000e+00 : f32
    %1 = vector.broadcast %cst : f32 to vector<8x8xf32>
    %2 = arith.mulf %0, %1 : vector<8x8xf32>
    %cst_1 = arith.constant dense<0xFF800000> : vector<8xf32>
    %3 = vector.multi_reduction <maximumf>, %2, %cst_1 [1] : vector<8x8xf32> to vector<8xf32>
    %4 = vector.shape_cast %3 : vector<8xf32> to vector<8x1xf32>
    %5 = vector.broadcast %4 : vector<8x1xf32> to vector<8x8xf32>
    %6 = arith.subf %2, %5 : vector<8x8xf32>
    %7 = math.exp %6 : vector<8x8xf32>
    %cst_2 = arith.constant dense<0.000000e+00> : vector<8xf32>
    %8 = vector.multi_reduction <add>, %7, %cst_2 [1] : vector<8x8xf32> to vector<8xf32>
    %9 = vector.shape_cast %8 : vector<8xf32> to vector<8x1xf32>
    %10 = tpu.reciprocal %9 : vector<8x1xf32> -> vector<8x1xf32>
    %11 = vector.broadcast %10 : vector<8x1xf32> to vector<8x8xf32>
    %12 = arith.mulf %7, %11 : vector<8x8xf32>
    %c0_3 = arith.constant 0 : index
    %c0_4 = arith.constant 0 : index
    %13 = vector.load %arg3[%c0_3, %c0_4] : memref<8x8xi32, #tpu.memory_space<vmem>>, vector<8x8xi32>
    %c0_i32 = arith.constant 0 : i32
    %14 = vector.broadcast %c0_i32 : i32 to vector<8x8xi32>
    %15 = arith.cmpi slt, %13, %14 : vector<8x8xi32>
    %c128_i32 = arith.constant 128 : i32
    %16 = vector.broadcast %c128_i32 : i32 to vector<8x8xi32>
    %17 = arith.addi %13, %16 : vector<8x8xi32>
    %18 = arith.select %15, %17, %13 : vector<8x8xi1>, vector<8x8xi32>
    %19 = tpu.iota {dimensions = array<i32: 1>} : vector<8x128xi32>
    %cst_5 = arith.constant 0.000000e+00 : f32
    %20 = vector.broadcast %cst_5 : f32 to vector<8x128xf32>
    %21 = vector.extract_strided_slice %18 {offsets = [0, 0], sizes = [8, 1], strides = [1, 1]} : vector<8x8xi32> to vector<8x1xi32>
    %22 = vector.broadcast %21 : vector<8x1xi32> to vector<8x128xi32>
    %23 = arith.cmpi eq, %19, %22 : vector<8x128xi32>
    %24 = vector.extract_strided_slice %12 {offsets = [0, 0], sizes = [8, 1], strides = [1, 1]} : vector<8x8xf32> to vector<8x1xf32>
    %cst_6 = arith.constant 0.000000e+00 : f32
    %25 = vector.shape_cast %24 : vector<8x1xf32> to vector<8x1xf32>
    %26 = vector.broadcast %25 : vector<8x1xf32> to vector<8x128xf32>
    %27 = vector.broadcast %cst_6 : f32 to vector<8x128xf32>
    %28 = arith.select %23, %26, %27 : vector<8x128xi1>, vector<8x128xf32>
    %29 = arith.addf %20, %28 : vector<8x128xf32>
    %30 = vector.extract_strided_slice %18 {offsets = [0, 1], sizes = [8, 1], strides = [1, 1]} : vector<8x8xi32> to vector<8x1xi32>
    %31 = vector.broadcast %30 : vector<8x1xi32> to vector<8x128xi32>
    %32 = arith.cmpi eq, %19, %31 : vector<8x128xi32>
    %33 = vector.extract_strided_slice %12 {offsets = [0, 1], sizes = [8, 1], strides = [1, 1]} : vector<8x8xf32> to vector<8x1xf32>
    %cst_7 = arith.constant 0.000000e+00 : f32
    %34 = vector.shape_cast %33 : vector<8x1xf32> to vector<8x1xf32>
    %35 = vector.broadcast %34 : vector<8x1xf32> to vector<8x128xf32>
    %36 = vector.broadcast %cst_7 : f32 to vector<8x128xf32>
    %37 = arith.select %32, %35, %36 : vector<8x128xi1>, vector<8x128xf32>
    %38 = arith.addf %29, %37 : vector<8x128xf32>
    %39 = vector.extract_strided_slice %18 {offsets = [0, 2], sizes = [8, 1], strides = [1, 1]} : vector<8x8xi32> to vector<8x1xi32>
    %40 = vector.broadcast %39 : vector<8x1xi32> to vector<8x128xi32>
    %41 = arith.cmpi eq, %19, %40 : vector<8x128xi32>
    %42 = vector.extract_strided_slice %12 {offsets = [0, 2], sizes = [8, 1], strides = [1, 1]} : vector<8x8xf32> to vector<8x1xf32>
    %cst_8 = arith.constant 0.000000e+00 : f32
    %43 = vector.shape_cast %42 : vector<8x1xf32> to vector<8x1xf32>
    %44 = vector.broadcast %43 : vector<8x1xf32> to vector<8x128xf32>
    %45 = vector.broadcast %cst_8 : f32 to vector<8x128xf32>
    %46 = arith.select %41, %44, %45 : vector<8x128xi1>, vector<8x128xf32>
    %47 = arith.addf %38, %46 : vector<8x128xf32>
    %48 = vector.extract_strided_slice %18 {offsets = [0, 3], sizes = [8, 1], strides = [1, 1]} : vector<8x8xi32> to vector<8x1xi32>
    %49 = vector.broadcast %48 : vector<8x1xi32> to vector<8x128xi32>
    %50 = arith.cmpi eq, %19, %49 : vector<8x128xi32>
    %51 = vector.extract_strided_slice %12 {offsets = [0, 3], sizes = [8, 1], strides = [1, 1]} : vector<8x8xf32> to vector<8x1xf32>
    %cst_9 = arith.constant 0.000000e+00 : f32
    %52 = vector.shape_cast %51 : vector<8x1xf32> to vector<8x1xf32>
    %53 = vector.broadcast %52 : vector<8x1xf32> to vector<8x128xf32>
    %54 = vector.broadcast %cst_9 : f32 to vector<8x128xf32>
    %55 = arith.select %50, %53, %54 : vector<8x128xi1>, vector<8x128xf32>
    %56 = arith.addf %47, %55 : vector<8x128xf32>
    %57 = vector.extract_strided_slice %18 {offsets = [0, 4], sizes = [8, 1], strides = [1, 1]} : vector<8x8xi32> to vector<8x1xi32>
    %58 = vector.broadcast %57 : vector<8x1xi32> to vector<8x128xi32>
    %59 = arith.cmpi eq, %19, %58 : vector<8x128xi32>
    %60 = vector.extract_strided_slice %12 {offsets = [0, 4], sizes = [8, 1], strides = [1, 1]} : vector<8x8xf32> to vector<8x1xf32>
    %cst_10 = arith.constant 0.000000e+00 : f32
    %61 = vector.shape_cast %60 : vector<8x1xf32> to vector<8x1xf32>
    %62 = vector.broadcast %61 : vector<8x1xf32> to vector<8x128xf32>
    %63 = vector.broadcast %cst_10 : f32 to vector<8x128xf32>
    %64 = arith.select %59, %62, %63 : vector<8x128xi1>, vector<8x128xf32>
    %65 = arith.addf %56, %64 : vector<8x128xf32>
    %66 = vector.extract_strided_slice %18 {offsets = [0, 5], sizes = [8, 1], strides = [1, 1]} : vector<8x8xi32> to vector<8x1xi32>
    %67 = vector.broadcast %66 : vector<8x1xi32> to vector<8x128xi32>
    %68 = arith.cmpi eq, %19, %67 : vector<8x128xi32>
    %69 = vector.extract_strided_slice %12 {offsets = [0, 5], sizes = [8, 1], strides = [1, 1]} : vector<8x8xf32> to vector<8x1xf32>
    %cst_11 = arith.constant 0.000000e+00 : f32
    %70 = vector.shape_cast %69 : vector<8x1xf32> to vector<8x1xf32>
    %71 = vector.broadcast %70 : vector<8x1xf32> to vector<8x128xf32>
    %72 = vector.broadcast %cst_11 : f32 to vector<8x128xf32>
    %73 = arith.select %68, %71, %72 : vector<8x128xi1>, vector<8x128xf32>
    %74 = arith.addf %65, %73 : vector<8x128xf32>
    %75 = vector.extract_strided_slice %18 {offsets = [0, 6], sizes = [8, 1], strides = [1, 1]} : vector<8x8xi32> to vector<8x1xi32>
    %76 = vector.broadcast %75 : vector<8x1xi32> to vector<8x128xi32>
    %77 = arith.cmpi eq, %19, %76 : vector<8x128xi32>
    %78 = vector.extract_strided_slice %12 {offsets = [0, 6], sizes = [8, 1], strides = [1, 1]} : vector<8x8xf32> to vector<8x1xf32>
    %cst_12 = arith.constant 0.000000e+00 : f32
    %79 = vector.shape_cast %78 : vector<8x1xf32> to vector<8x1xf32>
    %80 = vector.broadcast %79 : vector<8x1xf32> to vector<8x128xf32>
    %81 = vector.broadcast %cst_12 : f32 to vector<8x128xf32>
    %82 = arith.select %77, %80, %81 : vector<8x128xi1>, vector<8x128xf32>
    %83 = arith.addf %74, %82 : vector<8x128xf32>
    %84 = vector.extract_strided_slice %18 {offsets = [0, 7], sizes = [8, 1], strides = [1, 1]} : vector<8x8xi32> to vector<8x1xi32>
    %85 = vector.broadcast %84 : vector<8x1xi32> to vector<8x128xi32>
    %86 = arith.cmpi eq, %19, %85 : vector<8x128xi32>
    %87 = vector.extract_strided_slice %12 {offsets = [0, 7], sizes = [8, 1], strides = [1, 1]} : vector<8x8xf32> to vector<8x1xf32>
    %cst_13 = arith.constant 0.000000e+00 : f32
    %88 = vector.shape_cast %87 : vector<8x1xf32> to vector<8x1xf32>
    %89 = vector.broadcast %88 : vector<8x1xf32> to vector<8x128xf32>
    %90 = vector.broadcast %cst_13 : f32 to vector<8x128xf32>
    %91 = arith.select %86, %89, %90 : vector<8x128xi1>, vector<8x128xf32>
    %92 = arith.addf %83, %91 : vector<8x128xf32>
    %93 = arith.truncf %92 : vector<8x128xf32> to vector<8x128xbf16>
    %c0_14 = arith.constant 0 : index
    %c0_15 = arith.constant 0 : index
    %94 = vector.load %arg4[%c0_14, %c0_15] : memref<128x128xbf16, #tpu.memory_space<vmem>>, vector<128x128xbf16>
    %cst_16 = arith.constant dense<0.000000e+00> : vector<8x128xf32>
    %95 = tpu.matmul %93, %94, %cst_16 {dimension_numbers = #tpu.dot_dimension_numbers<[1], [0], [0], [1], [0, 0, 1, 1], [], []>} : vector<8x128xbf16>, vector<128x128xbf16>, vector<8x128xf32> -> vector<8x128xf32>
    %96 = arith.truncf %95 : vector<8x128xf32> to vector<8x128xbf16>
    %c0_17 = arith.constant 0 : index
    %c0_18 = arith.constant 0 : index
    %97 = vector.load %arg5[%c0_17, %c0_18] : memref<128x128xbf16, #tpu.memory_space<vmem>>, vector<128x128xbf16>
    %cst_19 = arith.constant dense<0.000000e+00> : vector<8x128xf32>
    %98 = tpu.matmul %96, %97, %cst_19 {dimension_numbers = #tpu.dot_dimension_numbers<[1], [0], [0], [1], [0, 0, 1, 1], [], []>} : vector<8x128xbf16>, vector<128x128xbf16>, vector<8x128xf32> -> vector<8x128xf32>
    %c0_20 = arith.constant 0 : index
    %c0_21 = arith.constant 0 : index
    %99 = vector.load %arg6[%c0_20, %c0_21] : memref<8x128xf32, #tpu.memory_space<vmem>>, vector<8x128xf32>
    tpu.vector_store %arg6[%c0_20, %c0_21], %98 {strides = array<i32>} : memref<8x128xf32, #tpu.memory_space<vmem>>, vector<8x128xf32>,
    return
  }
  func.func @transform_0(%arg0: i32, %arg1: i32) -> (i32, i32) {
    %c0_i32 = arith.constant 0 : i32
    %c0_i32_0 = arith.constant 0 : i32
    return %arg0, %c0_i32 : i32, i32
  }
  func.func @transform_1(%arg0: i32, %arg1: i32) -> (i32, i32) {
    %c0_i32 = arith.constant 0 : i32
    %c0_i32_0 = arith.constant 0 : i32
    return %arg0, %c0_i32 : i32, i32
  }
  func.func @transform_2(%arg0: i32, %arg1: i32) -> (i32, i32) {
    %c0_i32 = arith.constant 0 : i32
    %c0_i32_0 = arith.constant 0 : i32
    %c0_i32_1 = arith.constant 0 : i32
    return %c0_i32, %c0_i32_0 : i32, i32
  }
  func.func @transform_3(%arg0: i32, %arg1: i32) -> (i32, i32) {
    %c0_i32 = arith.constant 0 : i32
    %c0_i32_0 = arith.constant 0 : i32
    return %c0_i32, %arg1 : i32, i32
  }
  func.func @transform_4(%arg0: i32, %arg1: i32) -> (i32, i32) {
    %c0_i32 = arith.constant 0 : i32
    return %arg0, %arg1 : i32, i32
  }
}

</mosaic_0001>

<bundles_post_ra>
// kernel: tpu_custom_call.1
= control target key start
LH: loop header
LB: loop body
LE: loop exit
PB: predicated region body
PF: predicated region fallthrough
CT: control target
= control target key end

     0   :  { %9 = vsyncpa [#allocation3], 0  ;;  %s748_s0 = inlined_call_operand.hbm [shape: f32[8,8], index: 0, kind: input, shape index: {}]   ;;  %s749_s1 = inlined_call_operand.hbm [shape: s32[8,8], index: 1, kind: input, shape index: {}]   ;;  %s750_s2 = inlined_call_operand.hbm [shape: bf16[128,128], index: 2, kind: input, shape index: {}]   ;;  %s751_s3 = inlined_call_operand.hbm [shape: bf16[128,128], index: 3, kind: input, shape index: {}]   ;;  %s752_s4 = inlined_call_operand.hbm [shape: f32[8,128], index: 4, kind: output, shape index: {}]  }
   0x1   :  { %10 = vsyncpa [#allocation6], 0 }
   0x2   :  { %11 = vsyncpa [#allocation9], 0 }
   0x3   :  { %12 = vsyncpa [#allocation4], 0  ;;  %s644_s15 = smov [#allocation5]   ;;  %s645_s17 = smov [#allocation2]  }
   0x4   :  { %s29_s16 = sshll.u32 %s644_s15, 4  ;;  %s19_s18 = sshll.u32 %s645_s17, 4  ;;  %s30_s16 = int_to_ptr.vmem [resolvable:$true] %s29_s16  ;;  %s20_s18 = int_to_ptr.vmem [resolvable:$true] %s19_s18 }
   0x5   :  { %s526_s21 = scalar_lea.hbm %s749_s1, 128 }
   0x6   :  { %p527_p0 = scmp.ne.s32.totalorder %s749_s1, %s526_s21  ;;  %p530_p1 = scmp.lt.u32.totalorder %s526_s21, %s749_s1 }
   0x8   :  { %p532_p2 = pnand %p530_p1, %p527_p0 }
   0xa   :  { %535 = shalt.err (!%p532_p2)
}
   0xb   :  { %s536_s26 = scalar_lea.vmem %s30_s16, 128  ;;  %p541_p4 = scmp.lt.s32.totalorder %s30_s16, %s30_s16 }
   0xc   :  { %p537_p3 = scmp.ne.s32.totalorder %s30_s16, %s536_s26  ;;  %p542_p5 = scmp.lt.s32.totalorder %s536_s26, %s536_s26 }
   0xe   :  { %p543_p6 = por %p542_p5, %p541_p4 }
  0x10   :  { %p544_p7 = pnand %p543_p6, %p537_p3 }
  0x12   :  { %547 = shalt.err (!%p544_p7)
}
  0x13   :  { %32 = dma.hbm_to_vmem [thread:$0]  %s749_s1, 128, %s30_s16, [#allocation6]  }
  0x14   :  { %s548_s5 = scalar_lea.hbm %s748_s0, 128 }
  0x15   :  { %p549_p8 = scmp.ne.s32.totalorder %s748_s0, %s548_s5  ;;  %p552_p9 = scmp.lt.u32.totalorder %s548_s5, %s748_s0 }
  0x17   :  { %p554_p10 = pnand %p552_p9, %p549_p8 }
  0x19   :  { %557 = shalt.err (!%p554_p10)
}
  0x1a   :  { %s558_s10 = scalar_lea.vmem %s20_s18, 128  ;;  %p563_p12 = scmp.lt.s32.totalorder %s20_s18, %s20_s18 }
  0x1b   :  { %p559_p11 = scmp.ne.s32.totalorder %s20_s18, %s558_s10  ;;  %p564_p13 = scmp.lt.s32.totalorder %s558_s10, %s558_s10 }
  0x1d   :  { %p565_p0 = por %p564_p13, %p563_p12 }
  0x1f   :  { %p566_p1 = pnand %p565_p0, %p559_p11 }
  0x21   :  { %569 = shalt.err (!%p566_p1)
}
  0x22   :  { %22 = dma.hbm_to_vmem [thread:$0]  %s748_s0, 128, %s20_s18, [#allocation3]  }
  0x23   :  { %s646_s12 = smov [#allocation7]   ;;  %s570_s16 = scalar_lea.hbm %s750_s2, 1024 }
  0x24   :  { %s38_s13 = sshll.u32 %s646_s12, 4  ;;  %p571_p2 = scmp.ne.s32.totalorder %s750_s2, %s570_s16  ;;  %s39_s13 = int_to_ptr.vmem [resolvable:$true] %s38_s13 }
  0x25   :  { %p574_p3 = scmp.lt.u32.totalorder %s570_s16, %s750_s2 }
  0x27   :  { %p576_p4 = pnand %p574_p3, %p571_p2 }
  0x29   :  { %579 = shalt.err (!%p576_p4)
}
  0x2a   :  { %s580_s22 = scalar_lea.vmem %s39_s13, 1024  ;;  %p585_p6 = scmp.lt.s32.totalorder %s39_s13, %s39_s13 }
  0x2b   :  { %p581_p5 = scmp.ne.s32.totalorder %s39_s13, %s580_s22  ;;  %p586_p7 = scmp.lt.s32.totalorder %s580_s22, %s580_s22 }
  0x2d   :  { %p587_p8 = por %p586_p7, %p585_p6 }
  0x2f   :  { %p588_p9 = pnand %p587_p8, %p581_p5 }
  0x31   :  { %591 = shalt.err (!%p588_p9)
}
  0x32   :  { %s647_s0 = smov 64   ;;  %s648_s18 = smov 4  }
  0x33   :  { %44 = dma.hbm_to_vmem [thread:$0]  %s750_s2, 1024, %s39_s13, [#allocation6], %s647_s0, %s647_s0, %s648_s18  }
  0x34   :  { %s649_s25 = smov [#allocation8]   ;;  %s592_s29 = scalar_lea.hbm %s751_s3, 1024 }
  0x35   :  { %s50_s26 = sshll.u32 %s649_s25, 4  ;;  %p593_p10 = scmp.ne.s32.totalorder %s751_s3, %s592_s29  ;;  %s51_s26 = int_to_ptr.vmem [resolvable:$true] %s50_s26 }
  0x36   :  { %p596_p11 = scmp.lt.u32.totalorder %s592_s29, %s751_s3 }
  0x38   :  { %p598_p12 = pnand %p596_p11, %p593_p10 }
  0x3a   :  { %601 = shalt.err (!%p598_p12)
}
  0x3b   :  { %s602_s8 = scalar_lea.vmem %s51_s26, 1024  ;;  %p607_p0 = scmp.lt.s32.totalorder %s51_s26, %s51_s26 }
  0x3c   :  { %p603_p13 = scmp.ne.s32.totalorder %s51_s26, %s602_s8  ;;  %p608_p1 = scmp.lt.s32.totalorder %s602_s8, %s602_s8 }
  0x3e   :  { %p609_p2 = por %p608_p1, %p607_p0 }
  0x40   :  { %p610_p3 = pnand %p609_p2, %p603_p13 }
  0x42   :  { %613 = shalt.err (!%p610_p3)
}
  0x43   :  { %56 = dma.hbm_to_vmem [thread:$0]  %s751_s3, 1024, %s51_s26, [#allocation9], %s647_s0, %s647_s0, %s648_s18  }
  0x44   :  { %636 = dma.done.wait [#allocation3], 128  }
  0x45   :  { %637 = vsyncadd [#allocation3], 4294967168 }
  0x46   :  { %638 = dma.done.wait [#allocation6], 1152  }
  0x47   :  { %639 = vsyncadd [#allocation6], 4294966144 }
  0x48   :  { %640 = dma.done.wait [#allocation9], 1024  }
  0x49   :  { %641 = vsyncadd [#allocation9], 4294966272  ;;  %v70_v0 = vld [vmem:[#allocation2] sm:$0xff]  ;;  %vm72_vm0 = vcmask 64512   ;;  %v84_v3 = vld [vmem:[#allocation5] sm:$0xff]  ;;  %v650_v4 = vmov 0   ;;  %v88_v47 = vlaneseq }
  0x4a   :  { %v71_v1 = vmul.f32 2.0, %v70_v0  ;;  %490 = vset.pattern.permute.xlu1 %v650_v4  ;;  %vm85_vm1 = vcmp.lt.s32.totalorder %v84_v3, 0  ;;  %v86_v5 = vadd.s32 128, %v84_v3  ;;  %492 = vset.pattern.permute.xlu0 %v650_v4  ;;  %v651_v7 = vmov 1   ;;  %v506_v21 = vld [vmem:[#allocation7] sm:$0xff]   ;;  %v507_v24 = vld [vmem:[#allocation7 + $0x8] sm:$0xff]  }
  0x4b   :  { %v652_v8 = vmov 2   ;;  %v653_v9 = vmov 3   ;;  %v654_v10 = vmov 4   ;;  %v655_v16 = vmov 5   ;;  %v508_v25 = vld [vmem:[#allocation7 + $0x10] sm:$0xff]   ;;  %v509_v26 = vld [vmem:[#allocation7 + $0x18] sm:$0xff]  }
  0x4c   :  { %v73_v2 = vsel %vm72_vm0, %v71_v1, -inf  ;;  %v87_v6 = vsel %vm85_vm1, %v86_v5, %v84_v3  ;;  %v656_v17 = vmov 6   ;;  %v657_v22 = vmov 0.0   ;;  %v510_v27 = vld [vmem:[#allocation7 + $0x20] sm:$0xff]   ;;  %v511_v28 = vld [vmem:[#allocation7 + $0x28] sm:$0xff]   ;;  %v512_v29 = vld [vmem:[#allocation7 + $0x30] sm:$0xff]  }
  0x4d   :  { %74 = vmax.xlane.f32.xlu0 %v73_v2  ;;  %91 = vperm.xlu1 %490, %v87_v6   ;;  %v658_v23 = vmov 7   ;;  %v513_v30 = vld [vmem:[#allocation7 + $0x38] sm:$0xff]   ;;  %vm659_vm2 = vmmov 0   ;;  %v514_v31 = vld [vmem:[#allocation8] sm:$0xff]   ;;  %v515_v32 = vld [vmem:[#allocation8 + $0x8] sm:$0xff]   ;;  %v89_v49 = vand.u32 127, %v88_v47 }
  0x4e   :  { %433 = vmatprep.subr.bf16.mxu0 %v657_v22  ;;  %453 = vmatprep.subr.bf16.mxu1 %v657_v22  ;;  %v516_v33 = vld [vmem:[#allocation8 + $0x10] sm:$0xff]   ;;  %v517_v34 = vld [vmem:[#allocation8 + $0x18] sm:$0xff]   ;;  %v518_v35 = vld [vmem:[#allocation8 + $0x20] sm:$0xff]   ;;  %s660_s3 = smov [#allocation10]  }
  0x4f   :  { %434 = vmatpush3.bf16.msra.mxu0 %v506_v21  ;;  %449 = vmatprep.mubr.msk.bf16.mxu0 %vm659_vm2, %v657_v22  ;;  %v519_v36 = vld [vmem:[#allocation8 + $0x28] sm:$0xff]   ;;  %v520_v37 = vld [vmem:[#allocation8 + $0x30] sm:$0xff]   ;;  %s388_s10 = sshll.u32 %s660_s3, 4  ;;  %s389_s10 = int_to_ptr.vmem [resolvable:$true] %s388_s10 }
  0x50   :  { %435 = vmatprep.subr.bf16.mxu0 %v657_v22  ;;  %469 = vmatprep.mubr.msk.bf16.mxu1 %vm659_vm2, %v657_v22  ;;  %s614_s1 = scalar_lea.vmem %s389_s10, 128  ;;  %p619_p5 = scmp.lt.s32.totalorder %s389_s10, %s389_s10 }
  0x51   :  { %491 = vset.pattern.permute.xlu1 %v651_v7  ;;  %454 = vmatpush3.bf16.msra.mxu1 %v514_v31  ;;  %p615_p4 = scmp.ne.s32.totalorder %s389_s10, %s614_s1  ;;  %p620_p6 = scmp.lt.s32.totalorder %s614_s1, %s614_s1 }
  0x52   :  { %102 = vperm.xlu1 %491, %v87_v6   ;;  %455 = vmatprep.subr.bf16.mxu1 %v657_v22 }
  0x53   :  { %436 = vmatpush3.bf16.msra.mxu0 %v507_v24  ;;  %p621_p7 = por %p620_p6, %p619_p5 }
  0x54   :  { %437 = vmatprep.subr.bf16.mxu0 %v657_v22 }
  0x55   :  { %456 = vmatpush3.bf16.msra.mxu1 %v515_v32  ;;  %p622_p8 = pnand %p621_p7, %p615_p4 }
  0x56   :  { %493 = vset.pattern.permute.xlu1 %v652_v8  ;;  %457 = vmatprep.subr.bf16.mxu1 %v657_v22 }
  0x57   :  { %112 = vperm.xlu1 %493, %v87_v6   ;;  %438 = vmatpush3.bf16.msra.mxu0 %v508_v25 }
  0x58   :  { %439 = vmatprep.subr.bf16.mxu0 %v657_v22 }
  0x59   :  { %458 = vmatpush3.bf16.msra.mxu1 %v516_v33 }
  0x5a   :  { %459 = vmatprep.subr.bf16.mxu1 %v657_v22 }
  0x5b   :  { %494 = vset.pattern.permute.xlu1 %v653_v9  ;;  %440 = vmatpush3.bf16.msra.mxu0 %v509_v26 }
  0x5c   :  { %122 = vperm.xlu1 %494, %v87_v6   ;;  %441 = vmatprep.subr.bf16.mxu0 %v657_v22 }
  0x5d   :  { %460 = vmatpush3.bf16.msra.mxu1 %v517_v34 }
  0x5e   :  { %461 = vmatprep.subr.bf16.mxu1 %v657_v22 }
  0x5f   :  { %442 = vmatpush3.bf16.msra.mxu0 %v510_v27 }
  0x60   :  { %495 = vset.pattern.permute.xlu1 %v654_v10  ;;  %443 = vmatprep.subr.bf16.mxu0 %v657_v22 }
  0x61   :  { %132 = vperm.xlu1 %495, %v87_v6   ;;  %462 = vmatpush3.bf16.msra.mxu1 %v518_v35 }
  0x62   :  { %463 = vmatprep.subr.bf16.mxu1 %v657_v22 }
  0x63   :  { %444 = vmatpush3.bf16.msra.mxu0 %v511_v28 }
  0x64   :  { %445 = vmatprep.subr.bf16.mxu0 %v657_v22 }
  0x65   :  { %496 = vset.pattern.permute.xlu1 %v655_v16  ;;  %464 = vmatpush3.bf16.msra.mxu1 %v519_v36 }
  0x66   :  { %142 = vperm.xlu1 %496, %v87_v6   ;;  %465 = vmatprep.subr.bf16.mxu1 %v657_v22 }
  0x67   :  { %446 = vmatpush3.bf16.msra.mxu0 %v512_v29 }
  0x68   :  { %447 = vmatprep.subr.bf16.mxu0 %v657_v22 }
  0x69   :  { %466 = vmatpush3.bf16.msra.mxu1 %v520_v37 }
  0x6a   :  { %497 = vset.pattern.permute.xlu1 %v656_v17  ;;  %467 = vmatprep.subr.bf16.mxu1 %v657_v22 }
  0x6b   :  { %152 = vperm.xlu1 %497, %v87_v6   ;;  %448 = vmatpush3.bf16.msra.mxu0 %v513_v30 }
  0x6f   :  { %498 = vset.pattern.permute.xlu1 %v651_v7 }
  0xcc   :  { %v92_v38 = vpop.permute.xlu1 %91 }
  0xcd   :  { %vm93_vm3 = vcmp.eq.s32.totalorder %v89_v49, %v92_v38 }
  0xd1   :  { %v103_v39 = vpop.permute.xlu1 %102 }
  0xd2   :  { %vm104_vm4 = vcmp.eq.s32.totalorder %v89_v49, %v103_v39 }
  0xd6   :  { %v113_v40 = vpop.permute.xlu1 %112 }
  0xd7   :  { %vm114_vm5 = vcmp.eq.s32.totalorder %v89_v49, %v113_v40 }
  0xda   :  { %v75_v11 = vpop.xlane.xlu0 %74 }
  0xdb   :  { %v76_v12 = vsub.f32 %v71_v1, %v75_v11  ;;  %v123_v41 = vpop.permute.xlu1 %122 }
  0xdc   :  { %vm124_vm6 = vcmp.eq.s32.totalorder %v89_v49, %v123_v41 }
  0xdd   :  { %v77_v13 = vmul.f32 1.442695, %v76_v12 }
  0xdf   :  { %522 = vpow2.f32 %v77_v13 }
  0xe0   :  { %v133_v42 = vpop.permute.xlu1 %132 }
  0xe1   :  { %vm134_vm7 = vcmp.eq.s32.totalorder %v89_v49, %v133_v42 }
  0xe5   :  { %v143_v43 = vpop.permute.xlu1 %142 }
  0xe6   :  { %vm144_vm8 = vcmp.eq.s32.totalorder %v89_v49, %v143_v43 }
  0xe9   :  { %v523_v14 = vpop.eup %522 }
  0xea   :  { %v79_v15 = vsel %vm72_vm0, %v523_v14, 0.0  ;;  %v153_v44 = vpop.permute.xlu1 %152 }
  0xeb   :  { %80 = vadd.xlane.f32.xlu0 %v79_v15  ;;  %vm154_vm9 = vcmp.eq.s32.totalorder %v89_v49, %v153_v44 }
 0x178   :  { %v81_v18 = vpop.xlane.xlu0 %80 }
 0x179   :  { %524 = vrcp.f32 %v81_v18 }
 0x183   :  { %v525_v19 = vpop.eup %524 }
 0x184   :  { %v83_v20 = vmul.f32 %v525_v19, %v523_v14 }
 0x186   :  { %106 = vperm.xlu1 %498, %v83_v20   ;;  %96 = vperm.xlu0 %492, %v83_v20  }
 0x18a   :  { %499 = vset.pattern.permute.xlu1 %v652_v8  ;;  %504 = vset.pattern.permute.xlu0 %v658_v23  ;;  %v521_v8 = vld [vmem:[#allocation8 + $0x38] sm:$0xff]  }
 0x18b   :  { %116 = vperm.xlu1 %499, %v83_v20   ;;  %162 = vperm.xlu0 %504, %v87_v6  }
 0x18c   :  { %468 = vmatpush3.bf16.msra.mxu1 %v521_v8 }
 0x18f   :  { %500 = vset.pattern.permute.xlu1 %v653_v9 }
 0x190   :  { %126 = vperm.xlu1 %500, %v83_v20  }
 0x194   :  { %501 = vset.pattern.permute.xlu1 %v654_v10 }
 0x195   :  { %136 = vperm.xlu1 %501, %v83_v20  }
 0x199   :  { %502 = vset.pattern.permute.xlu1 %v655_v16 }
 0x19a   :  { %146 = vperm.xlu1 %502, %v83_v20  }
 0x19e   :  { %503 = vset.pattern.permute.xlu1 %v656_v17 }
 0x19f   :  { %156 = vperm.xlu1 %503, %v83_v20  }
 0x1a3   :  { %505 = vset.pattern.permute.xlu1 %v658_v23 }
 0x1a4   :  { %166 = vperm.xlu1 %505, %v83_v20  }
 0x205   :  { %v107_v45 = vpop.permute.xlu1 %106  ;;  %v97_v50 = vpop.permute.xlu0 %96 }
 0x206   :  { %v109_v52 = vsel %vm104_vm4, %v107_v45, 0.0  ;;  %v99_v53 = vsel %vm93_vm3, %v97_v50, 0.0 }
 0x207   :  { %v110_v55 = vadd.f32 %v109_v52, %v99_v53 }
 0x20a   :  { %v117_v46 = vpop.permute.xlu1 %116  ;;  %v163_v63 = vpop.permute.xlu0 %162 }
 0x20b   :  { %v119_v54 = vsel %vm114_vm5, %v117_v46, 0.0  ;;  %vm164_vm10 = vcmp.eq.s32.totalorder %v89_v49, %v163_v63 }
 0x20c   :  { %v120_v58 = vadd.f32 %v119_v54, %v110_v55 }
 0x20f   :  { %v127_v48 = vpop.permute.xlu1 %126 }
 0x210   :  { %v129_v57 = vsel %vm124_vm6, %v127_v48, 0.0 }
 0x211   :  { %v130_v60 = vadd.f32 %v129_v57, %v120_v58 }
 0x214   :  { %v137_v51 = vpop.permute.xlu1 %136 }
 0x215   :  { %v139_v59 = vsel %vm134_vm7, %v137_v51, 0.0 }
 0x216   :  { %v140_v0 = vadd.f32 %v139_v59, %v130_v60 }
 0x219   :  { %v147_v56 = vpop.permute.xlu1 %146 }
 0x21a   :  { %v149_v61 = vsel %vm144_vm8, %v147_v56, 0.0 }
 0x21b   :  { %v150_v2 = vadd.f32 %v149_v61, %v140_v0 }
 0x21e   :  { %v157_v62 = vpop.permute.xlu1 %156 }
 0x21f   :  { %v159_v1 = vsel %vm154_vm9, %v157_v62, 0.0 }
 0x220   :  { %v160_v3 = vadd.f32 %v159_v1, %v150_v2 }
 0x223   :  { %v167_v4 = vpop.permute.xlu1 %166 }
 0x224   :  { %v169_v5 = vsel %vm164_vm10, %v167_v4, 0.0 }
 0x225   :  { %v170_v6 = vadd.f32 %v169_v5, %v160_v3 }
 0x227   :  { %v171_v7 = vpack.c.bf16 %v170_v6, %v170_v6 }
 0x229   :  { %450 = vmatmul.mubr.bf16.vlgmr.msra.gmra.mrb[0].mxu0 %v171_v7 }
 0x2fc   :  { %v270_v9 = vpop.f32.mrb[0].mxu0 }
 0x2fd   :  { %v276_v10 = vpack.c.bf16 %v270_v9, %v270_v9  ;;  %v451_v11 = vpop.f32.mrb[1].mxu0 }
 0x2fe   :  { %v273_v12 = vpop.f32.mrb[2].mxu0 }
 0x2ff   :  { %v452_v13 = vpop.f32.mrb[3].mxu0  ;;  %470 = vmatmul.mubr.bf16.vlgmr.msra.gmra.mrb[0].mxu1 %v276_v10 }
 0x3d2   :  { %v375_v14 = vpop.f32.mrb[0].mxu1 }
 0x3d3   :  { %381 = vst [vmem:[#allocation10] sm:$0xff] %v375_v14  ;;  %v471_v15 = vpop.f32.mrb[1].mxu1 }
 0x3d4   :  { %v378_v16 = vpop.f32.mrb[2].mxu1 }
 0x3d5   :  { %625 = shalt.err (!%p622_p8)
}
 0x3d6   :  { %s626_s13 = scalar_lea.hbm %s752_s4, 128 }
 0x3d7   :  { %p627_p9 = scmp.ne.s32.totalorder %s752_s4, %s626_s13  ;;  %p630_p10 = scmp.lt.u32.totalorder %s626_s13, %s752_s4 }
 0x3d9   :  { %p632_p11 = pnand %p630_p10, %p627_p9 }
 0x3db   :  { %635 = shalt.err (!%p632_p11)
}
 0x3dc   :  { %391 = dma.vmem_to_hbm [thread:$0]  %s389_s10, 128, %s752_s4, [#allocation4]   ;;  %v472_v17 = vpop.f32.mrb[3].mxu1 }
 0x3dd   :  { %642 = dma.done.wait [#allocation4], 128  }
 0x3de   :  { %643 = vsyncadd [#allocation4], 4294967168 }
 0x3df   :  { %395 = vsyncpa [#allocation3], 1 }
 0x3e0   :  { %396 = vsyncpa [#allocation6], 1 }
 0x3e1   :  { %397 = vsyncpa [#allocation9], 1 }
 0x3e2   :  { %398 = vsyncpa [#allocation4], 1 }

</bundles_post_ra>
